<compile_context>
chip_gen: v7x
topology: tpu7x:2x2x1
jax: 0.10.0
libtpu: 0.0.40
codegen_flags: <defaults>
</compile_context>

<pallas_src>
from functools import partial

import numpy as np
import jax
import jax.numpy as jnp
from jax.experimental import pallas as pl
from jax.experimental.pallas import tpu as pltpu

LEAKY_RATE = 0.1


# ----------------------------------------------------------------------------
# Kernel: one (batch, N-tile) step =  W @ cols + b  followed by LeakyReLU
# ----------------------------------------------------------------------------
def _conv1d_kernel(x_ref, w_ref, b_ref, o_ref, *, negative_slope):
    # x_ref: (1, K, TN)   w_ref: (C_out, K)   b_ref: (C_out, 1)   o_ref: (1, C_out, TN)
    y = jnp.dot(w_ref[...], x_ref[0], preferred_element_type=jnp.float32)  # MXU: [C_out, TN]
    y = y + b_ref[...]                                                     # bias (lane bcast)
    # LeakyReLU(negative_slope); slope=0.0 degenerates to ReLU.
    o_ref[0] = jnp.maximum(y, negative_slope * y)


def conv1d_forward(x, weight, bias, *, stride=1, padding=0, use_leaky=True, tile_n=256):
    """Conv1d.forward: x [B, C_in, N] -> y [B, C_out, N_out] (float32)."""
    B, Cin, N = x.shape
    Cout, Cin_w, ks = weight.shape
    assert Cin_w == Cin

    x = x.astype(jnp.float32)

    # ---- im2col in the wrapper (no-op for the default kernel_size=1, stride=1) ----
    if padding:
        x = jnp.pad(x, ((0, 0), (0, 0), (padding, padding)))
    Np = x.shape[2]
    N_out = (Np - ks) // stride + 1
    if ks == 1 and stride == 1:
        cols = x                                                   # [B, Cin, N_out]
    else:
        # cols[b, c*ks + t, n] = x_pad[b, c, n*stride + t]
        slices = [x[:, :, t: t + stride * N_out: stride] for t in range(ks)]
        cols = jnp.stack(slices, axis=2).reshape(B, Cin * ks, N_out)
    K = Cin * ks

    w2 = weight.reshape(Cout, K).astype(jnp.float32)               # [Cout, K]
    b2 = bias.reshape(Cout, 1).astype(jnp.float32)                 # [Cout, 1]

    # ---- lane-aligned N tiling (multiple of 128, or the full extent) ----
    if N_out % tile_n == 0 and tile_n % 128 == 0:
        tn = tile_n
    elif N_out % 128 == 0:
        tn = 128
    else:
        tn = N_out                                                 # full-extent block is always legal
    n_tiles = N_out // tn

    slope = LEAKY_RATE if use_leaky else 0.0
    kernel = partial(_conv1d_kernel, negative_slope=slope)

    out = pl.pallas_call(
        kernel,
        out_shape=jax.ShapeDtypeStruct((B, Cout, N_out), jnp.float32),
        grid_spec=pltpu.PrefetchScalarGridSpec(
            num_scalar_prefetch=0,
            grid=(B, n_tiles),
            in_specs=[
                pl.BlockSpec((1, K, tn), lambda b, n: (b, 0, n)),     # cols tile (lane = N)
                pl.BlockSpec((Cout, K), lambda b, n: (0, 0)),         # weight (resident)
                pl.BlockSpec((Cout, 1), lambda b, n: (0, 0)),         # bias (resident)
            ],
            out_specs=pl.BlockSpec((1, Cout, tn), lambda b, n: (b, 0, n)),  # lane-dense stores
        ),
        compiler_params=pltpu.CompilerParams(
            dimension_semantics=("parallel", "parallel")),
    )(cols, w2, b2)
    return out


# ----------------------------------------------------------------------------
# Pure-JAX reference (lax.conv_general_dilated) for validation
# ----------------------------------------------------------------------------
def conv1d_reference(x, weight, bias, *, stride=1, padding=0, use_leaky=True):
    dn = ('NCH', 'OIH', 'NCH')
    y = jax.lax.conv_general_dilated(
        x.astype(jnp.float32), weight.astype(jnp.float32),
        window_strides=(stride,), padding=[(padding, padding)],
        dimension_numbers=dn)
    y = y + bias[None, :, None]
    slope = LEAKY_RATE if use_leaky else 0.0
    return jnp.maximum(y, slope * y)


if __name__ == "__main__":
    key = jax.random.PRNGKey(0)
    B, Cin, Cout, N = 2, 32, 64, 512     # x: [B, in_channels, N]

    k_x, k_w1, k_b1, k_w3, k_b3 = jax.random.split(key, 5)
    x = jax.random.normal(k_x, (B, Cin, N), dtype=jnp.float32)

    # ---- default module config: kernel_size=1, stride=1, padding=0, LeakyReLU(0.1) ----
    w1 = jax.random.normal(k_w1, (Cout, Cin, 1), jnp.float32) / np.sqrt(Cin)
    b1 = 0.01 * jax.random.normal(k_b1, (Cout,), jnp.float32)

    y1 = jax.block_until_ready(conv1d_forward(x, w1, b1))
    assert y1.shape == (B, Cout, N)
    ref1 = jax.block_until_ready(conv1d_reference(x, w1, b1))
    np.testing.assert_allclose(np.asarray(y1), np.asarray(ref1), rtol=2e-3, atol=2e-3)

    # ---- non-default config exercised through the same kernel: k=3, stride=1, padding=1 ----
    ks = 3
    w3 = jax.random.normal(k_w3, (Cout, Cin, ks), jnp.float32) / np.sqrt(Cin * ks)
    b3 = 0.01 * jax.random.normal(k_b3, (Cout,), jnp.float32)

    y3 = jax.block_until_ready(conv1d_forward(x, w3, b3, stride=1, padding=1))
    assert y3.shape == (B, Cout, N)
    ref3 = jax.block_until_ready(conv1d_reference(x, w3, b3, stride=1, padding=1))
    np.testing.assert_allclose(np.asarray(y3), np.asarray(ref3), rtol=2e-3, atol=2e-3)

    print("KERNEL_OK")
</pallas_src>

<mosaic_0001>
module attributes {stable_mosaic.version = 11 : i64} {
  func.func @_conv1d_kernel(%arg0: i32, %arg1: i32, %arg2: memref<1x32x256xf32, #tpu.memory_space<vmem>>, %arg3: memref<64x32xf32, #tpu.memory_space<vmem>>, %arg4: memref<64x1xf32, #tpu.memory_space<vmem>>, %arg5: memref<1x64x256xf32, #tpu.memory_space<vmem>>) attributes {dimension_semantics = [#tpu.dimension_semantics<parallel>, #tpu.dimension_semantics<parallel>], iteration_bounds = array<i64: 2, 2>, scalar_prefetch = 0 : i64, scratch_operands = 0 : i64, tpu.core_type = #tpu.core_type<tc>, window_params = [{transform_indices = @transform_0, window_bounds = array<i64: 1, 32, 256>}, {pipeline_mode = #tpu.pipeline_mode<synchronous>, transform_indices = @transform_1, window_bounds = array<i64: 64, 32>}, {pipeline_mode = #tpu.pipeline_mode<synchronous>, transform_indices = @transform_2, window_bounds = array<i64: 64, 1>}, {transform_indices = @transform_3, window_bounds = array<i64: 1, 64, 256>}]} {
    %c0 = arith.constant 0 : index
    %c0_0 = arith.constant 0 : index
    %0 = vector.load %arg3[%c0, %c0_0] : memref<64x32xf32, #tpu.memory_space<vmem>>, vector<64x32xf32>
    %c0_1 = arith.constant 0 : index
    %c0_2 = arith.constant 0 : index
    %c0_3 = arith.constant 0 : index
    %1 = vector.load %arg2[%c0_1, %c0_2, %c0_3] : memref<1x32x256xf32, #tpu.memory_space<vmem>>, vector<1x32x256xf32>
    %2 = vector.shape_cast %1 : vector<1x32x256xf32> to vector<32x256xf32>
    %cst = arith.constant dense<0.000000e+00> : vector<64x256xf32>
    %3 = tpu.matmul %0, %2, %cst {dimension_numbers = #tpu.dot_dimension_numbers<[1], [0], [0], [1], [0, 0, 1, 1], [], []>} : vector<64x32xf32>, vector<32x256xf32>, vector<64x256xf32> -> vector<64x256xf32>
    %c0_4 = arith.constant 0 : index
    %c0_5 = arith.constant 0 : index
    %4 = vector.load %arg4[%c0_4, %c0_5] : memref<64x1xf32, #tpu.memory_space<vmem>>, vector<64x1xf32>
    %5 = vector.broadcast %4 : vector<64x1xf32> to vector<64x256xf32>
    %6 = arith.addf %3, %5 : vector<64x256xf32>
    %cst_6 = arith.constant 1.000000e-01 : f32
    %7 = vector.broadcast %cst_6 : f32 to vector<64x256xf32>
    %8 = arith.mulf %7, %6 : vector<64x256xf32>
    %9 = arith.maximumf %6, %8 : vector<64x256xf32>
    %c0_7 = arith.constant 0 : index
    %c0_8 = arith.constant 0 : index
    %c0_9 = arith.constant 0 : index
    %10 = vector.load %arg5[%c0_7, %c0_8, %c0_9] : memref<1x64x256xf32, #tpu.memory_space<vmem>>, vector<1x64x256xf32>
    %11 = vector.shape_cast %10 : vector<1x64x256xf32> to vector<64x256xf32>
    %12 = vector.shape_cast %9 : vector<64x256xf32> to vector<1x64x256xf32>
    tpu.vector_store %arg5[%c0_7, %c0_8, %c0_9], %12 {strides = array<i32>} : memref<1x64x256xf32, #tpu.memory_space<vmem>>, vector<1x64x256xf32>,
    return
  }
  func.func @transform_0(%arg0: i32, %arg1: i32) -> (i32, i32, i32) {
    %c0_i32 = arith.constant 0 : i32
    %c0_i32_0 = arith.constant 0 : i32
    return %arg0, %c0_i32, %arg1 : i32, i32, i32
  }
  func.func @transform_1(%arg0: i32, %arg1: i32) -> (i32, i32) {
    %c0_i32 = arith.constant 0 : i32
    %c0_i32_0 = arith.constant 0 : i32
    %c0_i32_1 = arith.constant 0 : i32
    return %c0_i32, %c0_i32_0 : i32, i32
  }
  func.func @transform_2(%arg0: i32, %arg1: i32) -> (i32, i32) {
    %c0_i32 = arith.constant 0 : i32
    %c0_i32_0 = arith.constant 0 : i32
    %c0_i32_1 = arith.constant 0 : i32
    return %c0_i32, %c0_i32_0 : i32, i32
  }
  func.func @transform_3(%arg0: i32, %arg1: i32) -> (i32, i32, i32) {
    %c0_i32 = arith.constant 0 : i32
    %c0_i32_0 = arith.constant 0 : i32
    return %arg0, %c0_i32, %arg1 : i32, i32, i32
  }
}

</mosaic_0001>

<bundles_post_ra>
// kernel: tpu_custom_call.1
= control target key start
LH: loop header
LB: loop body
LE: loop exit
PB: predicated region body
PF: predicated region fallthrough
CT: control target
= control target key end

     0   :  { %8 = vsyncpa [#allocation3], 0  ;;  %s1130_s0 = inlined_call_operand.hbm [shape: f32[2,32,512], index: 0, kind: input, shape index: {}]   ;;  %s1131_s1 = inlined_call_operand.vmem [shape: f32[64,32], index: 1, kind: input, shape index: {}]   ;;  %s1132_s2 = inlined_call_operand.vmem [shape: f32[64,1], index: 2, kind: input, shape index: {}]   ;;  %s1133_s3 = inlined_call_operand.hbm [shape: f32[2,64,512], index: 3, kind: output, shape index: {}]  }
   0x1   :  { %10 = vsyncpa [#allocation3 + $0x1], 0 }
   0x2   :  { %11 = vsyncpa [#allocation4], 0 }
   0x3   :  { %13 = vsyncpa [#allocation4 + $0x1], 0  ;;  %s850_s12 = smov 0   ;;  %s852_s13 = smov 0  }
   0x4   :  { %s854_s14 = smov 0   ;;  %s856_s15 = smov 0  }
   0x5   :  { %s858_s16 = smov 0   ;;  %s860_s17 = smov 0  }
   0x6   :  { %s862_s18 = smov 0   ;;  %s864_s19 = smov 0  }
   0x7 LB: > { %s565_s20 = sadd.s32 4294967295, %s818_s19   ;;  %s566_s21 = sadd.s32 4294967294, %s818_s19   ;;  %s818_s19 = sphi %s864_s19, %s19_s19   ;;  %s814_s18 = sphi %s862_s18, %s1149_s18   ;;  %s810_s17 = sphi %s860_s17, %s1148_s17   ;;  %s806_s16 = sphi %s858_s16, %s1147_s16   ;;  %s802_s15 = sphi %s856_s15, %s1146_s15   ;;  %s798_s14 = sphi %s854_s14, %s1145_s14   ;;  %s794_s13 = sphi %s852_s13, %s1144_s13   ;;  %s790_s12 = sphi %s850_s12, %s1143_s12  }
   0x8   : > { %s28_s22 = sadd.s32 1, %s810_s17  ;;  %s31_s23 = sadd.s32 1, %s814_s18 }
   0x9   : > { %p29_p0 = scmp.ge.s32.totalorder %s28_s22, 2  ;;  %s40_s24 = sadd.s32 1, %s798_s14 }
   0xa   : > { %p47_p1 = scmp.ne.s32.totalorder %s798_s14, %s794_s13  ;;  %p48_p2 = scmp.eq.s32.totalorder %s818_s19, 0 }
   0xb   : > { %s1151_s22 = smov (%p29_p0, %s28_s22), 0  ;;  %s1153_s23 = smov (!%p29_p0, %s31_s23), %s814_s18 }
   0xc   : > { %s36_s25 = ssub.s32 %s810_s17, %s1151_s22  ;;  %p903_p3 = por %p48_p2, %p47_p1 }
   0xd   : > { %p33_p4 = scmp.ge.s32.totalorder %s1153_s23, 2  ;;  %p53_p5 = scmp.ne.s32.totalorder %s794_s13, %s790_s12 }
   0xe   : > { %p54_p6 = scmp.eq.s32.totalorder %s565_s20, 0  ;;  %p121_p7 = scmp.eq.s32.totalorder %s565_s20, 3 }
   0xf   : > { %s1155_s23 = smov (%p33_p4, %s1153_s23), 0  ;;  %p127_p10 = scmp.eq.s32.totalorder %s566_s21, 3 }
  0x10   : > { %p911_p8 = por %p54_p6, %p53_p5  ;;  %p915_p9 = por %p121_p7, %p47_p1 }
  0x11   : > { %s35_s29 = ssub.s32 %s814_s18, %s1155_s23  ;;  %p921_p12 = por %p127_p10, %p53_p5 }
  0x12   : > { %s1137_s28 = scalar_select %p915_p9, 1, 0 }
  0x13   : > { %s37_s30 = sor.u32 %s36_s25, %s35_s29  ;;  %p614_p13 = scmp.lt.s32.totalorder %s818_s19, 4 }
  0x14   : > { %p38_p11 = scmp.eq.s32.totalorder %s37_s30, 0  ;;  %s153_s5 = sand.u32 1, %s798_s14  }
  0x15   : > { %s1138_s4 = scalar_select %p921_p12, 1, 0 }
  0x16   : > { %s928_s6 = scalar_select %p38_p11, %s798_s14, %s40_s24  }
  0x17   : > { %s569_s7 = sshll.u32 %s153_s5, 6  ;;  %s570_s8 = sshll.u32 %s810_s17, 1 }
  0x18   : > { %s571_s9 = sshll.u32 %s814_s18, 4  ;;  %s157_s10 = scalar_lea.vmem [#allocation2], %s569_s7 }
  0x19   : > { %s166_s11 = sshll.u32 %s157_s10, 4  ;;  %s163_s20 = sadd.s32 %s571_s9, %s570_s8  ;;  %s932_s11 = int_to_ptr.vmem [resolvable:$true] %s166_s11 }
  0x1a   : > { %s572_s21 = sshll.u32 %s163_s20, 7  ;;  %p936_p0 = pnand %p614_p13, %p903_p3 }
  0x1b   : > { %s943_s24 = scalar_lea.hbm %s1130_s0, %s572_s21  ;;  %s946_s7 = scalar_lea.sflag [#allocation3], %s153_s5 }
  0x1c   : > { %s690_s8 = scalar_lea.hbm %s943_s24, 1024  ;;  %p692_p3 = pneg %p936_p0 }
  0x1d   : > { %p691_p2 = scmp.ne.s32.totalorder %s943_s24, %s690_s8  ;;  %s695_s10 = scalar_lea.hbm %s1130_s0, 4096 }
  0x1e   : > { %p696_p6 = scmp.lt.u32.totalorder %s943_s24, %s1130_s0  ;;  %p697_p7 = scmp.lt.u32.totalorder %s695_s10, %s690_s8 }
  0x1f   : > { %p693_p4 = pnand %p692_p3, %p691_p2  ;;  %p699_p11 = scmp.lt.u32.totalorder %s690_s8, %s943_s24 }
  0x20   : > { %p698_p10 = por %p697_p7, %p696_p6 }
  0x21   : > { %p694_p5 = pneg %p693_p4 }
  0x22   : > { %p700_p13 = por %p699_p11, %p698_p10 }
  0x24   : > { %p701_p1 = pnand %p700_p13, %p694_p5 }
  0x26   : > { %704 = shalt.err (!%p701_p1)
}
  0x27   : > { %s705_s5 = scalar_lea.vmem %s932_s11, 1024  ;;  %s820_s29 = smov [#allocation2]  }
  0x28   : > { %p706_p2 = scmp.ne.s32.totalorder %s932_s11, %s705_s5  ;;  %s710_s30 = sshll.u32 %s820_s29, 4  ;;  %s711_s30 = int_to_ptr.vmem [resolvable:$false] %s710_s30 }
  0x29   : > { %s712_s26 = scalar_lea.vmem %s711_s30, 2048  ;;  %p713_p9 = scmp.lt.s32.totalorder %s932_s11, %s711_s30 }
  0x2a   : > { %p708_p4 = pnand %p706_p2, %p692_p3  ;;  %p714_p6 = scmp.lt.s32.totalorder %s712_s26, %s705_s5 }
  0x2c   : > { %p709_p12 = pneg %p708_p4  ;;  %p715_p7 = por %p714_p6, %p713_p9 }
  0x2e   : > { %p716_p10 = pnand %p715_p7, %p709_p12 }
  0x30   : > { %719 = shalt.err (!%p716_p10)
}
  0x31   : > { %s821_s8 = smov 512   ;;  %s822_s9 = smov 256  }
  0x32   : > { %s823_s10 = smov 16   ;;  %p174_p1 = scmp.lt.s32.totalorder %s818_s19, 5 }
  0x33   : > { %609 = dma.hbm_to_vmem [thread:$0]  (!%p936_p0), %s943_s24, 1024, %s932_s11, %s946_s7, %s821_s8, %s822_s9, %s823_s10  }
  0x34   : > { %p1140_p3 = scmp.ge.s32.totalorder %s818_s19, 1 }
  0x36   : > { %p175_p5 = pnand %p1140_p3, %p174_p1 }
  0x37   : > { %s978_s20 = sand.u32 (!%p175_p5), 1, %s794_s13  }
  0x38   : > { %178 = sbr.rel (%p175_p5) target bundleno = 323 (0x143), region = 32  ;;  %s574_s21 = sshll.u32 (!%p175_p5), %s978_s20, 6 }
  0x39   : > { %s181_s5 = scalar_lea.sflag (!%p175_p5), [#allocation3], %s978_s20  ;;  %s184_s29 = scalar_lea.vmem (!%p175_p5), [#allocation2], %s574_s21 }
  0x3f   : > { %781 = dma.done.wait (%p911_p8), %s181_s5, 1024  }
  0x40   : > { %783 = vsyncadd (%p911_p8), %s181_s5, 4294966272  ;;  %v824_v0 = vmov 0.0   ;;  %v825_v1 = vmov 0   ;;  %v218_v2 = vld [vmem:[%s184_s29 + $0x8] sm:$0xff]  ;;  %v220_v3 = vld [vmem:[%s184_s29 + $0x18] sm:$0xff]  ;;  %vm273_vm0 = vcmask 261120  }
  0x41   : > { %362 = vmatprep.mubr.f32.mxu0 %v824_v0  ;;  %386 = vmatprep.mubr.f32.mxu1 %v824_v0  ;;  %v217_v4 = vld [vmem:[%s184_s29] sm:$0xff]  ;;  %v590_v5 = vpack.c.bf16 %v220_v3, %v218_v2  ;;  %v219_v6 = vld [vmem:[%s184_s29 + $0x10] sm:$0xff]  ;;  %v222_v7 = vld [vmem:[%s184_s29 + $0x28] sm:$0xff]  ;;  %s575_s26 = sshll.u32 %s978_s20, 7  ;;  %s585_s9 = sshll.u32 %s802_s15, 1 }
  0x42   : > { %689 = vset.pattern.permute.xlu1 %v825_v1  ;;  %688 = vset.pattern.permute.xlu0 %v825_v1  ;;  %v224_v8 = vld [vmem:[%s184_s29 + $0x38] sm:$0xff]  ;;  %v592_v9 = vpack.c.bf16 %v219_v6, %v217_v4  ;;  %v221_v11 = vld [vmem:[%s184_s29 + $0x20] sm:$0xff]  ;;  %v223_v12 = vld [vmem:[%s184_s29 + $0x30] sm:$0xff]  ;;  %s1045_s8 = scalar_lea.vmem [#allocation5], %s575_s26  ;;  %s586_s10 = sshll.u32 %s806_s16, 5 }
  0x43   : > { %v594_v10 = vpack.c.bf16 %v224_v8, %v222_v7  ;;  %591 = vmatprep.subr.bf16.mxu0 %v590_v5  ;;  %598 = vmatprep.subr.bf16.mxu1 %v590_v5  ;;  %v596_v13 = vpack.c.bf16 %v223_v12, %v221_v11  ;;  %v227_v14 = vld [vmem:[%s1132_s2 + $0x10] sm:$0xff]  ;;  %v225_v15 = vld [vmem:[%s1132_s2] sm:$0xff]  ;;  %v228_v16 = vld [vmem:[%s1132_s2 + $0x18] sm:$0xff]  ;;  %s1053_s15 = sadd.s32 %s586_s10, %s585_s9  ;;  %s475_s21 = sshll.u32 %s1045_s8, 4  ;;  %s1072_s21 = int_to_ptr.vmem [resolvable:$true] %s475_s21 }
  0x44   : > { %593 = vmatpush1.bf16.msra.mxu0 %v592_v9  ;;  %600 = vmatpush1.bf16.msra.mxu1 %v592_v9  ;;  %v226_v17 = vld [vmem:[%s1132_s2 + $0x8] sm:$0xff]  ;;  %v209_v18 = vld [vmem:[%s1131_s1] sm:$0xff]  ;;  %v232_v24 = vld [vmem:[%s1132_s2 + $0x38] sm:$0xff]  ;;  %s587_s16 = sshll.u32 %s1053_s15, 7  ;;  %s460_s11 = scalar_lea.sflag [#allocation4], %s978_s20 }
  0x45   : > { %595 = vmatprep.subr.bf16.mxu0 %v594_v10  ;;  %599 = vmatprep.subr.bf16.mxu1 %v594_v10  ;;  %v213_v19 = vld [vmem:[%s1131_s1 + $0x20] sm:$0xff]  ;;  %v230_v20 = vld [vmem:[%s1132_s2 + $0x28] sm:$0xff]  ;;  %v231_v25 = vld [vmem:[%s1132_s2 + $0x30] sm:$0xff]  ;;  %s1070_s27 = scalar_lea.hbm %s1133_s3, %s587_s16  ;;  %s720_s25 = scalar_lea.vmem %s1072_s21, 2048 }
  0x46   : > { %245 = vperm.xlu1 %689, %v227_v14   ;;  %235 = vperm.xlu0 %688, %v225_v15   ;;  %v229_v21 = vld [vmem:[%s1132_s2 + $0x20] sm:$0xff]  ;;  %v210_v22 = vld [vmem:[%s1131_s1 + $0x8] sm:$0xff]  ;;  %v211_v26 = vld [vmem:[%s1131_s1 + $0x10] sm:$0xff]  ;;  %p721_p8 = scmp.ne.s32.totalorder %s1072_s21, %s720_s25  ;;  %p1141_p9 = scmp.ne.s32.totalorder %s1137_s28, 0 }
  0x47   : > { %v214_v23 = vld [vmem:[%s1131_s1 + $0x28] sm:$0xff]  ;;  %v215_v27 = vld [vmem:[%s1131_s1 + $0x30] sm:$0xff]  ;;  %v212_v28 = vld [vmem:[%s1131_s1 + $0x18] sm:$0xff]  ;;  %s826_s24 = smov [#allocation5]  }
  0x48   : > { %597 = vmatpush1.bf16.msra.mxu0 %v596_v13  ;;  %601 = vmatpush1.bf16.msra.mxu1 %v596_v13  ;;  %v216_v29 = vld [vmem:[%s1131_s1 + $0x38] sm:$0xff]  ;;  %p722_p12 = pnand %p721_p8, %p1141_p9  ;;  %s724_s7 = sshll.u32 %s826_s24, 4  ;;  %s725_s7 = int_to_ptr.vmem [resolvable:$false] %s724_s7 }
  0x49   : > { %s726_s30 = scalar_lea.vmem %s725_s7, 4096  ;;  %p727_p11 = scmp.lt.s32.totalorder %s1072_s21, %s725_s7 }
  0x4a   : > { %250 = vperm.xlu1 %689, %v228_v16   ;;  %240 = vperm.xlu0 %688, %v226_v17   ;;  %p723_p0 = pneg %p722_p12  ;;  %p728_p13 = scmp.lt.s32.totalorder %s726_s30, %s720_s25 }
  0x4b   : > { %576 = vmatmul.mubr.msk.f32.vlgmr.msra.gmra.mrb[0].mxu0 %vm273_vm0, %v209_v18  ;;  %580 = vmatmul.mubr.msk.f32.vlgmr.msra.gmra.mrb[0].mxu1 %vm273_vm0, %v213_v19 }
  0x4c   : > { %368 = vmatprep.mubr.f32.mxu0 %v824_v0  ;;  %392 = vmatprep.mubr.f32.mxu1 %v824_v0  ;;  %p729_p2 = por %p728_p13, %p727_p11 }
  0x4e   : > { %260 = vperm.xlu1 %689, %v230_v20   ;;  %255 = vperm.xlu0 %688, %v229_v21   ;;  %p730_p4 = pnand %p729_p2, %p723_p0 }
  0x4f   : > { %577 = vmatmul.mubr.msk.f32.gmra.mrb[2].mxu0 %vm273_vm0, %v210_v22  ;;  %581 = vmatmul.mubr.msk.f32.gmra.mrb[2].mxu1 %vm273_vm0, %v214_v23 }
  0x50   : > { %374 = vmatprep.mubr.f32.mxu0 %v824_v0  ;;  %398 = vmatprep.mubr.f32.mxu1 %v824_v0 }
  0x52   : > { %270 = vperm.xlu1 %689, %v232_v24   ;;  %265 = vperm.xlu0 %688, %v231_v25  }
  0x53   : > { %578 = vmatmul.mubr.msk.f32.gmra.mrb[4].mxu0 %vm273_vm0, %v211_v26  ;;  %582 = vmatmul.mubr.msk.f32.gmra.mrb[4].mxu1 %vm273_vm0, %v215_v27 }
  0x54   : > { %380 = vmatprep.mubr.f32.mxu0 %v824_v0  ;;  %404 = vmatprep.mubr.f32.mxu1 %v824_v0 }
  0x57   : > { %579 = vmatmul.mubr.msk.f32.gmra.mrb[6].mxu0 %vm273_vm0, %v212_v28  ;;  %583 = vmatmul.mubr.msk.f32.gmra.mrb[6].mxu1 %vm273_vm0, %v216_v29 }
  0xc5   : > { %v236_v30 = vpop.permute.xlu0 %235  ;;  %v246_v31 = vpop.permute.xlu1 %245 }
  0xc9   : > { %v241_v32 = vpop.permute.xlu0 %240  ;;  %v1042_v33 = vpop.permute.xlu1 %250 }
  0xcd   : > { %v256_v34 = vpop.permute.xlu0 %255  ;;  %v261_v43 = vpop.permute.xlu1 %260 }
  0xd1   : > { %v266_v60 = vpop.permute.xlu0 %265  ;;  %v271_v13 = vpop.permute.xlu1 %270 }
 0x11e   : > { %v364_v35 = vpop.f32.mrb[0].mxu0  ;;  %v388_v36 = vpop.f32.mrb[0].mxu1 }
 0x11f   : > { %v365_v37 = vadd.f32 %v364_v35, %v236_v30  ;;  %v389_v38 = vadd.f32 %v388_v36, %v256_v34  ;;  %v366_v39 = vpop.f32.mrb[1].mxu0  ;;  %v390_v40 = vpop.f32.mrb[1].mxu1 }
 0x120   : > { %v367_v41 = vadd.f32 %v366_v39, %v236_v30  ;;  %v391_v42 = vadd.f32 %v390_v40, %v256_v34 }
 0x121   : > { %v411_v44 = vmul.f32 0.1, %v365_v37  ;;  %v419_v45 = vmul.f32 0.1, %v389_v38 }
 0x122   : > { %v412_v46 = vmul.f32 0.1, %v367_v41  ;;  %v420_v47 = vmul.f32 0.1, %v391_v42  ;;  %v370_v48 = vpop.f32.mrb[2].mxu0  ;;  %v394_v49 = vpop.f32.mrb[2].mxu1 }
 0x123   : > { %v427_v50 = vmax.f32 %v365_v37, %v411_v44  ;;  %v435_v51 = vmax.f32 %v389_v38, %v419_v45  ;;  %v371_v52 = vadd.f32 %v370_v48, %v241_v32  ;;  %v395_v53 = vadd.f32 %v394_v49, %v261_v43  ;;  %v372_v54 = vpop.f32.mrb[3].mxu0  ;;  %v396_v55 = vpop.f32.mrb[3].mxu1 }
 0x124   : > { %v428_v56 = vmax.f32 %v367_v41, %v412_v46  ;;  %v436_v57 = vmax.f32 %v391_v42, %v420_v47  ;;  %v373_v58 = vadd.f32 %v372_v54, %v241_v32  ;;  %v397_v59 = vadd.f32 %v396_v55, %v261_v43 }
 0x125   : > { %443 = vst [vmem:[%s1045_s8] sm:$0xff] %v427_v50  ;;  %451 = vst [vmem:[%s1045_s8 + $0x40] sm:$0xff] %v435_v51  ;;  %v413_v61 = vmul.f32 0.1, %v371_v52  ;;  %v421_v62 = vmul.f32 0.1, %v395_v53 }
 0x126   : > { %444 = vst [vmem:[%s1045_s8 + $0x8] sm:$0xff] %v428_v56  ;;  %452 = vst [vmem:[%s1045_s8 + $0x48] sm:$0xff] %v436_v57  ;;  %v414_v63 = vmul.f32 0.1, %v373_v58  ;;  %v422_v0 = vmul.f32 0.1, %v397_v59 }
 0x127   : > { %v376_v1 = vpop.f32.mrb[4].mxu0  ;;  %v400_v2 = vpop.f32.mrb[4].mxu1  ;;  %v429_v3 = vmax.f32 %v371_v52, %v413_v61  ;;  %v437_v4 = vmax.f32 %v395_v53, %v421_v62 }
 0x128   : > { %v377_v5 = vadd.f32 %v376_v1, %v246_v31  ;;  %v401_v6 = vadd.f32 %v400_v2, %v266_v60  ;;  %v378_v7 = vpop.f32.mrb[5].mxu0  ;;  %v402_v8 = vpop.f32.mrb[5].mxu1  ;;  %v430_v9 = vmax.f32 %v373_v58, %v414_v63  ;;  %v438_v10 = vmax.f32 %v397_v59, %v422_v0 }
 0x129   : > { %v379_v11 = vadd.f32 %v378_v7, %v246_v31  ;;  %v403_v12 = vadd.f32 %v402_v8, %v266_v60  ;;  %445 = vst [vmem:[%s1045_s8 + $0x10] sm:$0xff] %v429_v3  ;;  %453 = vst [vmem:[%s1045_s8 + $0x50] sm:$0xff] %v437_v4 }
 0x12a   : > { %v415_v14 = vmul.f32 0.1, %v377_v5  ;;  %v423_v15 = vmul.f32 0.1, %v401_v6  ;;  %446 = vst [vmem:[%s1045_s8 + $0x18] sm:$0xff] %v430_v9  ;;  %454 = vst [vmem:[%s1045_s8 + $0x58] sm:$0xff] %v438_v10 }
 0x12b   : > { %v416_v16 = vmul.f32 0.1, %v379_v11  ;;  %v424_v17 = vmul.f32 0.1, %v403_v12  ;;  %v382_v18 = vpop.f32.mrb[6].mxu0  ;;  %v406_v19 = vpop.f32.mrb[6].mxu1 }
 0x12c   : > { %v431_v20 = vmax.f32 %v377_v5, %v415_v14  ;;  %v439_v21 = vmax.f32 %v401_v6, %v423_v15  ;;  %v383_v22 = vadd.f32 %v382_v18, %v1042_v33  ;;  %v407_v23 = vadd.f32 %v406_v19, %v271_v13  ;;  %v384_v24 = vpop.f32.mrb[7].mxu0  ;;  %v408_v25 = vpop.f32.mrb[7].mxu1 }
 0x12d   : > { %v432_v26 = vmax.f32 %v379_v11, %v416_v16  ;;  %v440_v27 = vmax.f32 %v403_v12, %v424_v17  ;;  %v385_v28 = vadd.f32 %v384_v24, %v1042_v33  ;;  %v409_v29 = vadd.f32 %v408_v25, %v271_v13 }
 0x12e   : > { %447 = vst [vmem:[%s1045_s8 + $0x20] sm:$0xff] %v431_v20  ;;  %455 = vst [vmem:[%s1045_s8 + $0x60] sm:$0xff] %v439_v21  ;;  %v417_v30 = vmul.f32 0.1, %v383_v22  ;;  %v425_v31 = vmul.f32 0.1, %v407_v23 }
 0x12f   : > { %448 = vst [vmem:[%s1045_s8 + $0x28] sm:$0xff] %v432_v26  ;;  %456 = vst [vmem:[%s1045_s8 + $0x68] sm:$0xff] %v440_v27  ;;  %v418_v32 = vmul.f32 0.1, %v385_v28  ;;  %v426_v34 = vmul.f32 0.1, %v409_v29 }
 0x130   : > { %v433_v33 = vmax.f32 %v383_v22, %v417_v30  ;;  %v441_v35 = vmax.f32 %v407_v23, %v425_v31 }
 0x131   : > { %v434_v36 = vmax.f32 %v385_v28, %v418_v32  ;;  %v442_v37 = vmax.f32 %v409_v29, %v426_v34 }
 0x132   : > { %449 = vst [vmem:[%s1045_s8 + $0x30] sm:$0xff] %v433_v33  ;;  %457 = vst [vmem:[%s1045_s8 + $0x70] sm:$0xff] %v441_v35 }
 0x133   : > { %450 = vst [vmem:[%s1045_s8 + $0x38] sm:$0xff] %v434_v36  ;;  %458 = vst [vmem:[%s1045_s8 + $0x78] sm:$0xff] %v442_v37 }
 0x134   : > { %733 = shalt.err (!%p730_p4)
}
 0x135   : > { %s734_s26 = scalar_lea.hbm %s1070_s27, 2048  ;;  %s738_s10 = scalar_lea.hbm %s1133_s3, 8192 }
 0x136   : > { %p735_p6 = scmp.ne.s32.totalorder %s1070_s27, %s734_s26  ;;  %p739_p1 = scmp.lt.u32.totalorder %s1070_s27, %s1133_s3 }
 0x137   : > { %p740_p3 = scmp.lt.u32.totalorder %s738_s10, %s734_s26  ;;  %p742_p8 = scmp.lt.u32.totalorder %s734_s26, %s1070_s27 }
 0x138   : > { %p736_p7 = pnand %p735_p6, %p1141_p9 }
 0x139   : > { %p741_p5 = por %p740_p3, %p739_p1 }
 0x13a   : > { %p737_p10 = pneg %p736_p7 }
 0x13b   : > { %p743_p12 = por %p742_p8, %p741_p5 }
 0x13d   : > { %p744_p0 = pnand %p743_p12, %p737_p10 }
 0x13f   : > { %747 = shalt.err (!%p744_p0)
}
 0x140   : > { %s827_s5 = smov 256   ;;  %s828_s29 = smov 512  }
 0x141   : > { %s829_s25 = smov 16  }
 0x142   : > { %604 = dma.vmem_to_hbm [thread:$0]  (%p1141_p9), %s1072_s21, 2048, %s1070_s27, %s460_s11, %s827_s5, %s828_s29, %s829_s25  }
 0x143 PF: > { %p615_p11 = scmp.ge.s32.totalorder %s818_s19, 2  ;;  %s490_s24 = sand.u32 1, %s790_s12  }
 0x144   : > { %p1142_p13 = scmp.ne.s32.totalorder %s1138_s4, 0  ;;  %s491_s7 = scalar_lea.sflag [#allocation4], %s490_s24 }
 0x146   : > { %p611_p2 = pnand %p615_p11, %p1142_p13 }
 0x148   : > { %785 = dma.done.wait (!%p611_p2), %s491_s7, 2048  }
 0x149   : > { %787 = vsyncadd (!%p611_p2), %s491_s7, 4294965248  ;;  %s19_s19 = sadd.s32 1, %s818_s19   ;;  %s1143_s12 = smov %s794_s13 }
 0x14a   : > { %p16_p4 = scmp.ge.s32.totalorder %s19_s19, 6   ;;  %s1144_s13 = smov %s798_s14 }
 0x14b   : > { %s1145_s14 = smov %s928_s6  ;;  %s1146_s15 = smov %s810_s17 }
 0x14c   : > { %s1147_s16 = smov %s814_s18  ;;  %s1148_s17 = smov %s1151_s22 }
 0x14d   : > { %s1149_s18 = smov %s1155_s23  ;;  %18 = sbr.rel (!%p16_p4) target bundleno = 7 (0x7), region = 77 }
 0x154   :  { %496 = vsyncpa [#allocation3], 1 }
 0x155   :  { %498 = vsyncpa [#allocation3 + $0x1], 1 }
 0x156   :  { %499 = vsyncpa [#allocation4], 1 }
 0x157   :  { %501 = vsyncpa [#allocation4 + $0x1], 1 }

</bundles_post_ra>
